<compile_context>
chip_gen: v6e
topology: v6e:2x2x1
jax: 0.10.0
libtpu: 0.0.40
codegen_flags: <defaults>
</compile_context>

<pallas_src>
import jax
import jax.numpy as jnp
from jax.experimental import pallas as pl
from jax.experimental.pallas import tpu as pltpu


def _round_up(x, m):
    return (x + m - 1) // m * m


def easy_posterior_kernel(s_ref, rgb_ref, diff_ref):
    # s_ref:    (1,)     f32 SMEM  -- s_eff = max(s, 0.02) / 1e-4 (constant denom folded in)
    # rgb_ref:  (M, TF)  f32 VMEM  -- full-M block, lane tile of the flattened (N*3) axis
    # diff_ref: (1, TF)  f32 VMEM  -- per-column softplus sum over M
    rgb = rgb_ref[...]
    m = rgb.shape[0]
    mean = jnp.sum(rgb, axis=0, keepdims=True) / m               # (1, TF)
    z = s_ref[0] * jnp.abs(rgb - mean) - 5.0                     # (M, TF)
    diff_ref[...] = jnp.sum(jax.nn.softplus(z), axis=0, keepdims=True)


def easy_posterior_forward(x, rgb_all, dirs_all, mask_all, s, w, b, *, max_tile_cols=1536):
    """s: scalar parameter, w: (1,3) Linear weight, b: (1,) Linear bias.

    x / dirs_all / mask_all are unused by the reference forward.
    """
    del x, dirs_all, mask_all
    M, N, C = rgb_all.shape
    assert C == 3
    rgb2d = rgb_all.astype(jnp.float32).reshape(M, N * C)        # contiguous reshape, no copy
    F = N * C

    # Lane tile width: multiple of 128, capped by (a) a conservative VMEM budget for the
    # double-buffered full-M input block (safe on v7x's 64 MiB VMEM) and (b) the problem width.
    vmem_budget = 8 * 1024 * 1024
    tf_by_vmem = max(128, (vmem_budget // (2 * 4 * M)) // 128 * 128)
    tf = int(min(max_tile_cols, tf_by_vmem, _round_up(F, 128)))
    F_pad = _round_up(F, tf)
    if F_pad != F:
        # Only hit when N*3 is not already tile-aligned; padded columns are sliced off below.
        rgb2d = jnp.pad(rgb2d, ((0, 0), (0, F_pad - F)))
    num_tiles = F_pad // tf

    # Fold the constant 1e-4 denominator into the clamped scale (single SMEM scalar).
    s_eff = (jnp.maximum(jnp.asarray(s, jnp.float32), 0.02) / jnp.float32(1e-4)).reshape(1)

    # NOTE: full-M blocks keep rgb at a single HBM read (mean + softplus in one pass).
    # For very large M (full-M tile no longer fits VMEM) one would precompute rgb_mean in a
    # separate reduction pass and tile M as an "arbitrary" grid axis instead.
    diff = pl.pallas_call(
        easy_posterior_kernel,
        out_shape=jax.ShapeDtypeStruct((1, F_pad), jnp.float32),
        grid=(num_tiles,),
        in_specs=[
            pl.BlockSpec(memory_space=pltpu.MemorySpace.SMEM),   # s_eff scalar
            pl.BlockSpec((M, tf), lambda i: (0, i)),             # full-M, lane-dense tile
        ],
        out_specs=pl.BlockSpec((1, tf), lambda i: (0, i)),       # lane-dense output block
        compiler_params=pltpu.CompilerParams(
            dimension_semantics=("parallel",),
        ),
    )(s_eff, rgb2d)

    # Tiny epilogue on the (N, 3) result: likelihood + Linear(3 -> 1).
    likelihood = jnp.exp(-diff[0, :F].reshape(N, C))
    return likelihood @ w.T + b                                  # (N, 1)


def _ref_forward(rgb_all, s, w, b):
    """Pure-JAX reference mirroring the PyTorch forward exactly."""
    mx = jnp.max(rgb_all.reshape(-1, 3), axis=0)
    rgb = rgb_all / (mx - mx + jnp.float32(1e-4))
    rgb_mean = rgb.mean(0)
    d = jax.nn.softplus(jnp.maximum(s, 0.02) * jnp.abs(rgb - rgb_mean) - 5.0)
    diff = d.sum(0)
    likelihood = jnp.exp(-diff)                                  # (N, 3)
    return likelihood @ w.T + b                                  # (N, 1)


if __name__ == "__main__":
    key = jax.random.PRNGKey(0)
    k_rgb, k_rgb2, k_x, k_dirs, k_mask, k_w, k_b = jax.random.split(key, 7)

    # Parameters (mirrors nn.Linear(3, 1) default init bounds).
    s_param = jnp.float32(5.0)
    bound = 1.0 / jnp.sqrt(3.0)
    w = jax.random.uniform(k_w, (1, 3), minval=-bound, maxval=bound, dtype=jnp.float32)
    b = jax.random.uniform(k_b, (1,), minval=-bound, maxval=bound, dtype=jnp.float32)

    # --- Test 1: small shapes, natural [0,1) rgb scale (single-tile path) -----------------
    M, N = 8, 16
    x = jax.random.normal(k_x, (N, 3), dtype=jnp.float32)
    dirs_all = jax.random.normal(k_dirs, (M, N, 3), dtype=jnp.float32)
    mask_all = (jax.random.uniform(k_mask, (M, N)) > 0.5).astype(jnp.float32)
    rgb_all = jax.random.uniform(k_rgb, (M, N, 3), dtype=jnp.float32)

    out = easy_posterior_forward(x, rgb_all, dirs_all, mask_all, s_param, w, b)
    out = jax.block_until_ready(out)
    ref = _ref_forward(rgb_all, s_param, w, b)
    assert out.shape == (N, 1), out.shape
    assert jnp.allclose(out, ref, rtol=1e-4, atol=1e-5), (out, ref)

    # --- Test 2: multi-tile grid path; rgb scaled so the likelihood path is non-degenerate -
    M2, N2 = 32, 256
    rgb_all2 = jax.random.uniform(k_rgb2, (M2, N2, 3), dtype=jnp.float32) * 1e-4
    out2 = easy_posterior_forward(None, rgb_all2, None, None, s_param, w, b,
                                  max_tile_cols=384)
    out2 = jax.block_until_ready(out2)
    ref2 = _ref_forward(rgb_all2, s_param, w, b)
    assert out2.shape == (N2, 1), out2.shape
    assert jnp.allclose(out2, ref2, rtol=1e-4, atol=1e-5), float(jnp.max(jnp.abs(out2 - ref2)))

    print("KERNEL_OK")
</pallas_src>

<mosaic_0001>
module attributes {stable_mosaic.version = 11 : i64} {
  func.func @easy_posterior_kernel(%arg0: i32, %arg1: memref<1xf32, #tpu.memory_space<smem>>, %arg2: memref<8x128xf32, #tpu.memory_space<vmem>>, %arg3: memref<1x128xf32, #tpu.memory_space<vmem>>) attributes {dimension_semantics = [#tpu.dimension_semantics<parallel>], iteration_bounds = array<i64: 1>, scalar_prefetch = 0 : i64, scratch_operands = 0 : i64, tpu.core_type = #tpu.core_type<tc>, window_params = [{transform_indices = @transform_0, window_bounds = array<i64: 1>}, {transform_indices = @transform_1, window_bounds = array<i64: 8, 128>}, {transform_indices = @transform_2, window_bounds = array<i64: 1, 128>}]} {
    %c0 = arith.constant 0 : index
    %c0_0 = arith.constant 0 : index
    %0 = vector.load %arg2[%c0, %c0_0] : memref<8x128xf32, #tpu.memory_space<vmem>>, vector<8x128xf32>
    %cst = arith.constant dense<0.000000e+00> : vector<128xf32>
    %1 = vector.multi_reduction <add>, %0, %cst [0] : vector<8x128xf32> to vector<128xf32>
    %2 = vector.shape_cast %1 : vector<128xf32> to vector<1x128xf32>
    %cst_1 = arith.constant 8.000000e+00 : f32
    %3 = vector.broadcast %cst_1 : f32 to vector<1x128xf32>
    %4 = arith.divf %2, %3 : vector<1x128xf32>
    %c0_2 = arith.constant 0 : index
    %5 = memref.load %arg1[%c0_2] : memref<1xf32, #tpu.memory_space<smem>>
    %6 = vector.broadcast %4 : vector<1x128xf32> to vector<8x128xf32>
    %7 = arith.subf %0, %6 : vector<8x128xf32>
    %8 = math.absf %7 : vector<8x128xf32>
    %9 = vector.broadcast %5 : f32 to vector<8x128xf32>
    %10 = arith.mulf %9, %8 : vector<8x128xf32>
    %cst_3 = arith.constant 5.000000e+00 : f32
    %11 = vector.broadcast %cst_3 : f32 to vector<8x128xf32>
    %12 = arith.subf %10, %11 : vector<8x128xf32>
    %cst_4 = arith.constant 0.000000e+00 : f32
    %13 = vector.broadcast %cst_4 : f32 to vector<8x128xf32>
    %14 = arith.maximumf %12, %13 : vector<8x128xf32>
    %15 = vector.broadcast %cst_4 : f32 to vector<8x128xf32>
    %16 = arith.subf %12, %15 : vector<8x128xf32>
    %17 = arith.cmpf one, %16, %16 : vector<8x128xf32>
    %18 = vector.broadcast %cst_4 : f32 to vector<8x128xf32>
    %19 = arith.addf %12, %18 : vector<8x128xf32>
    %20 = math.absf %16 : vector<8x128xf32>
    %cst_5 = arith.constant 0.000000e+00 : f32
    %21 = vector.broadcast %cst_5 : f32 to vector<8x128xf32>
    %22 = arith.subf %21, %20 : vector<8x128xf32>
    %23 = math.exp %22 : vector<8x128xf32>
    %24 = math.log1p %23 : vector<8x128xf32>
    %25 = arith.addf %14, %24 : vector<8x128xf32>
    %26 = arith.select %17, %19, %25 : vector<8x128xi1>, vector<8x128xf32>
    %cst_6 = arith.constant dense<0.000000e+00> : vector<128xf32>
    %27 = vector.multi_reduction <add>, %26, %cst_6 [0] : vector<8x128xf32> to vector<128xf32>
    %28 = vector.shape_cast %27 : vector<128xf32> to vector<1x128xf32>
    %c0_7 = arith.constant 0 : index
    %c0_8 = arith.constant 0 : index
    %29 = vector.load %arg3[%c0_7, %c0_8] : memref<1x128xf32, #tpu.memory_space<vmem>>, vector<1x128xf32>
    tpu.vector_store %arg3[%c0_7, %c0_8], %28 {strides = array<i32>} : memref<1x128xf32, #tpu.memory_space<vmem>>, vector<1x128xf32>,
    return
  }
  func.func @transform_0(%arg0: i32) -> i32 {
    %c0_i32 = arith.constant 0 : i32
    %c0_i32_0 = arith.constant 0 : i32
    return %c0_i32 : i32
  }
  func.func @transform_1(%arg0: i32) -> (i32, i32) {
    %c0_i32 = arith.constant 0 : i32
    %c0_i32_0 = arith.constant 0 : i32
    return %c0_i32, %arg0 : i32, i32
  }
  func.func @transform_2(%arg0: i32) -> (i32, i32) {
    %c0_i32 = arith.constant 0 : i32
    %c0_i32_0 = arith.constant 0 : i32
    return %c0_i32, %arg0 : i32, i32
  }
}

</mosaic_0001>

<bundles_post_ra>
// kernel: tpu_custom_call.1
= control target key start
LH: loop header
LB: loop body
LE: loop exit
PB: predicated region body
PF: predicated region fallthrough
CT: control target
= control target key end

     0   :  { %8 = vsyncpa [#allocation4], 0  ;;  %s157_s0 = inlined_call_operand.<no memory space> [shape: f32[1], index: 0, kind: input, shape index: {}]   ;;  %s158_s1 = inlined_call_operand.hbm [shape: f32[8,128], index: 1, kind: input, shape index: {}]   ;;  %s159_s2 = inlined_call_operand.hbm [shape: f32[1,128], index: 2, kind: output, shape index: {}]  }
   0x1   :  { %9 = vsyncpa [#allocation5], 0  ;;  %s131_s9 = smov [#allocation3]  }
   0x2   :  { %s18_s10 = sshll.u32 %s131_s9, 4  ;;  %s19_s10 = int_to_ptr.vmem [resolvable:$true] %s18_s10 }
   0x3   :  { %s95_s11 = scalar_lea.vmem %s19_s10, 128  ;;  %p100_p1 = scmp.lt.s32.totalorder %s19_s10, %s19_s10 }
   0x4   :  { %p96_p0 = scmp.ne.s32.totalorder %s19_s10, %s95_s11  ;;  %p101_p2 = scmp.lt.s32.totalorder %s95_s11, %s95_s11 }
   0x6   :  { %p102_p3 = por %p101_p2, %p100_p1 }
   0x8   :  { %p103_p4 = pnand %p102_p3, %p96_p0 }
   0xa   :  { %106 = shalt.err (!%p103_p4)
}
   0xb   :  { %21 = dma.hbm_to_vmem [thread:$0]  %s158_s1, 128, %s19_s10, [#allocation4]  }
   0xc   :  { %127 = dma.done.wait [#allocation4], 128  }
   0xd   :  { %128 = vsyncadd [#allocation4], 4294967168  ;;  %v25_v0 = vld [vmem:[#allocation3] sm:$0xff]  ;;  %v37_v9 = vstv %s157_s0  ;;  %s132_s0 = smov [#allocation6]  }
   0xe   :  { %v26_v1 = vrot.slane %v25_v0, 4  ;;  %s71_s1 = sshll.u32 %s132_s0, 4  ;;  %s72_s1 = int_to_ptr.vmem [resolvable:$true] %s71_s1 }
   0xf   :  { %s107_s16 = scalar_lea.vmem %s72_s1, 16  ;;  %s111_s17 = scalar_lea.vmem %s72_s1, 32 }
  0x10   :  { %v27_v2 = vadd.f32 %v26_v1, %v25_v0  ;;  %p108_p5 = scmp.ne.s32.totalorder %s72_s1, %s107_s16  ;;  %p112_p6 = scmp.lt.s32.totalorder %s72_s1, %s72_s1 }
  0x11   :  { %p113_p7 = scmp.lt.s32.totalorder %s111_s17, %s107_s16 }
  0x12   :  { %v28_v3 = vrot.slane %v27_v2, 2 }
  0x13   :  { %p114_p8 = por %p113_p7, %p112_p6 }
  0x14   :  { %v29_v4 = vadd.f32 %v28_v3, %v27_v2 }
  0x15   :  { %p115_p9 = pnand %p114_p8, %p108_p5 }
  0x16   :  { %v30_v5 = vrot.slane %v29_v4, 1 }
  0x18   :  { %v31_v6 = vadd.f32 %v30_v5, %v29_v4 }
  0x1a   :  { %v33_v7 = vmul.f32 0.125, %v31_v6 }
  0x1c   :  { %v35_v8 = vsub.f32 %v25_v0, %v33_v7 }
  0x1e   :  { %v36_v10 = vand.u32 2147483647, %v35_v8 }
  0x20   :  { %v38_v11 = vmul.f32 %v37_v9, %v36_v10 }
  0x22   :  { %v80_v12 = vadd.f32 -5.0, %v38_v11 }
  0x24   :  { %v43_v13 = vand.u32 2147483647, %v80_v12  ;;  %v40_v23 = vmax.f32 %v80_v12, 0.0  ;;  %vm41_vm1 = vcmp.ne.f32.partialorder %v80_v12, %v80_v12 }
  0x26   :  { %v44_v14 = vsub.f32 0.0, %v43_v13 }
  0x28   :  { %v45_v15 = vmul.f32 1.442695, %v44_v14 }
  0x2a   :  { %83 = vpow2.f32 %v45_v15 }
  0x37   :  { %v84_v16 = vpop.eup %83 }
  0x38   :  { %v47_v17 = vadd.f32 1.0, %v84_v16  ;;  %v50_v18 = vmul.f32 -0.5, %v84_v16  ;;  %v53_v20 = vand.u32 2147483647, %v84_v16 }
  0x3a   :  { %85 = vlog2.f32 %v47_v17  ;;  %v51_v19 = vadd.f32 1.0, %v50_v18  ;;  %vm54_vm0 = vcmp.lt.f32.partialorder %v53_v20, 0.0004427343 }
  0x3c   :  { %v52_v21 = vmul.f32 %v84_v16, %v51_v19 }
  0x47   :  { %v86_v22 = vpop.eup %85 }
  0x48   :  { %v49_v24 = vmul.f32 0.6931472, %v86_v22 }
  0x4a   :  { %v55_v25 = vsel %vm54_vm0, %v52_v21, %v49_v24 }
  0x4b   :  { %v56_v26 = vadd.f32 %v55_v25, %v40_v23 }
  0x4d   :  { %v57_v27 = vsel %vm41_vm1, %v80_v12, %v56_v26 }
  0x4e   :  { %v58_v28 = vrot.slane %v57_v27, 4 }
  0x50   :  { %v59_v29 = vadd.f32 %v58_v28, %v57_v27 }
  0x52   :  { %v60_v30 = vrot.slane %v59_v29, 2 }
  0x54   :  { %v61_v31 = vadd.f32 %v60_v30, %v59_v29 }
  0x56   :  { %v62_v32 = vrot.slane %v61_v31, 1 }
  0x58   :  { %v63_v33 = vadd.f32 %v62_v32, %v61_v31 }
  0x5a   :  { %64 = vst [vmem:[#allocation6] sm:$0x1] %v63_v33 }
  0x5b   :  { %118 = shalt.err (!%p115_p9)
}
  0x5c   :  { %74 = dma.vmem_to_hbm [thread:$0]  %s72_s1, 16, %s159_s2, [#allocation5]  }
  0x5d   :  { %129 = dma.done.wait [#allocation5], 16  }
  0x5e   :  { %130 = vsyncadd [#allocation5], 4294967280 }
  0x5f   :  { %78 = vsyncpa [#allocation4], 1 }
  0x60   :  { %79 = vsyncpa [#allocation5], 1 }

</bundles_post_ra>
